<compile_context>
chip_gen: v7x
topology: tpu7x:2x2x1
jax: 0.10.0
libtpu: 0.0.40
codegen_flags: <defaults>
</compile_context>

<pallas_src>
import math

import jax
import jax.numpy as jnp
from jax.experimental import pallas as pl
from jax.experimental.pallas import tpu as pltpu

_LANE = 128
_N_ALIGN = 256                 # MXU-width-friendly N tile on v6e/v7x (lane-multiple on v5e)
_TARGET_STEP_BYTES = 4 << 20   # ~4 MiB streamed per grid step (amortizes ~0.35us/step)


def _round_up(x, m):
    return ((x + m - 1) // m) * m


def _sublane_rows(dtype):
    # 8 rows for 32-bit, 16 for bf16/fp16, 32 for int8 (sub-32-bit packs sublanes).
    return max(8, 32 // jnp.dtype(dtype).itemsize)


def _vmem_capacity_bytes():
    """Generation-aware physical VMEM; conservative fallback = v7x per-TC 64 MiB."""
    try:
        cap = getattr(pltpu.get_tpu_info(), "vmem_capacity_bytes", None)
        if cap:
            return int(cap)
    except Exception:
        pass
    return 64 << 20


# ----------------------------- Pallas kernel --------------------------------
def _linear_kernel(x_ref, w_ref, b_ref, o_ref):
    # One (batch tile, out tile): MXU matmul with f32 accumulation,
    # f32 bias add, then a single cast + lane-dense store.
    acc = jnp.dot(x_ref[...], w_ref[...], preferred_element_type=jnp.float32)
    o_ref[...] = (acc + b_ref[...].astype(jnp.float32)).astype(o_ref.dtype)


def pallas_linear(x, w, b, *, max_out_tile=None):
    """y = x @ w + b as a batch-tiled, lane-dense Pallas TPU kernel.

    x: [B, IN]   w: [IN, OUT]   b: [1, OUT] (or [OUT])   ->  y: [B, OUT]
    max_out_tile: optional soft cap on the OUT tile width (testing / tuning).
    """
    B, IN = x.shape
    IN_w, OUT = w.shape
    assert IN_w == IN, (IN_w, IN)
    if b.ndim == 1:
        b = b.reshape(1, -1)

    dtype = x.dtype
    itemsize = jnp.dtype(dtype).itemsize
    sub = _sublane_rows(dtype)

    # Lane-dense output: pad OUT to a multiple of 128 with zero W/b columns
    # (sliced off at the end). Only the small W/b arrays are padded, never x.
    OUT_P = _round_up(OUT, _LANE)
    if OUT_P != OUT:
        w = jnp.pad(w, ((0, 0), (0, OUT_P - OUT)))
        b = jnp.pad(b, ((0, 0), (0, OUT_P - OUT)))

    vmem_cap = _vmem_capacity_bytes()
    budget = int(vmem_cap * 0.75)          # headroom for compiler internal scratch

    # ---- OUT (N) tiling: keep the (double-buffer accounted) weight slab within
    # ~half the budget; small heads get TILE_N == OUT_P (weights stay resident).
    w_budget = budget // 2
    max_tile_n = max(_LANE, (w_budget // (2 * max(IN, 1) * itemsize)) // _LANE * _LANE)
    if max_out_tile is not None:
        max_tile_n = min(max_tile_n, max(_LANE, _round_up(max_out_tile, _LANE)))
    if OUT_P <= max_tile_n:
        TILE_N = OUT_P
    else:
        TILE_N = max(_N_ALIGN, (max_tile_n // _N_ALIGN) * _N_ALIGN)
    grid_n = pl.cdiv(OUT_P, TILE_N)

    # ---- batch (M) tiling: no jnp.pad on x; ragged last block handled by Pallas.
    wb_bytes = 2 * (IN * TILE_N + TILE_N) * itemsize   # W + b counted double-buffered
    per_row = (IN + TILE_N) * itemsize                 # streamed x row + out row
    if B <= sub:
        TILE_B = B                                     # block equals full batch dim
    else:
        tile = max(sub, (_TARGET_STEP_BYTES // per_row) // sub * sub)
        # Fit double-buffered x/out tiles alongside W/b inside the VMEM budget.
        fit = max(sub, ((budget - wb_bytes) // (2 * per_row)) // sub * sub)
        tile = min(tile, fit)
        # >= 2 batch tiles so v7x can shard grid steps across both TensorCores.
        tile = min(tile, _round_up(pl.cdiv(B, 2), sub))
        tile = min(tile, _round_up(B, sub))
        TILE_B = tile
    grid_b = pl.cdiv(B, TILE_B)

    tile_bytes = 2 * TILE_B * per_row + wb_bytes
    vmem_limit = int(min(max(8 << 20, 2 * tile_bytes), int(vmem_cap * 0.85)))

    cost = pl.CostEstimate(
        flops=2 * B * IN * OUT_P,
        transcendentals=0,
        bytes_accessed=(B * IN + IN * OUT_P + OUT_P + B * OUT_P) * itemsize,
    )

    y = pl.pallas_call(
        _linear_kernel,
        out_shape=jax.ShapeDtypeStruct((B, OUT_P), dtype),
        grid=(grid_b, grid_n),
        in_specs=[
            pl.BlockSpec((TILE_B, IN), lambda i, j: (i, 0)),   # streamed batch tiles
            pl.BlockSpec((IN, TILE_N), lambda i, j: (0, j)),   # weight column tiles
            pl.BlockSpec((1, TILE_N), lambda i, j: (0, j)),    # bias column tiles
        ],
        out_specs=pl.BlockSpec((TILE_B, TILE_N), lambda i, j: (i, j)),
        compiler_params=pltpu.CompilerParams(
            dimension_semantics=("parallel", "parallel"),
            vmem_limit_bytes=vmem_limit,
        ),
        cost_estimate=cost,
    )(x, w, b)

    return y if OUT_P == OUT else y[:, :OUT]


# --------------------------- HeadBuilder (JAX) -------------------------------
class OutputSpec:
    def __init__(self, dim, type_):
        self.dim = dim
        self.type = type_


def _init_linear_params(key, in_dim, out_dim, dtype=jnp.float32):
    """Matches nn.Linear default init U(-1/sqrt(in), 1/sqrt(in))."""
    k_w, k_b = jax.random.split(key)
    bound = 1.0 / math.sqrt(in_dim)
    # PyTorch stores weight as [out, in]; we store transposed [in, out] for x @ W.
    w = jax.random.uniform(k_w, (in_dim, out_dim), dtype, -bound, bound)
    b = jax.random.uniform(k_b, (1, out_dim), dtype, -bound, bound)
    return w, b


class HeadBuilder:
    """JAX/Pallas port of surreal HeadBuilder: lazy linear head(s) on first forward."""

    def __init__(self, output_spec, key):
        self._dims = output_spec.dim
        self._type = output_spec.type
        self._head = None
        self._fused = None
        self._key = key

    def __call__(self, obs):
        in_dim = obs.shape[1]
        out_dim = self._dims[0]
        if self._head is None:
            if self._type in ("discrete", "continuous"):
                self._head = _init_linear_params(self._key, in_dim, out_dim)
            elif self._type == "gaussian":
                k_mean, k_std = jax.random.split(self._key)
                self._head = {
                    "mean": _init_linear_params(k_mean, in_dim, out_dim),
                    "std": _init_linear_params(k_std, in_dim, out_dim),
                }
                # Fuse once at construction (not per forward): one pallas_call,
                # obs DMA'd and matmul'd exactly once per call.
                names = ["mean", "std"]
                w_cat = jnp.concatenate([self._head[k][0] for k in names], axis=1)
                b_cat = jnp.concatenate([self._head[k][1] for k in names], axis=1)
                splits = [(k, self._head[k][0].shape[1]) for k in names]
                self._fused = (w_cat, b_cat, splits)
            elif self._type == "scalar":
                self._head = _init_linear_params(self._key, in_dim, 1)
            elif self._type == "distributional":
                raise NotImplementedError
            else:
                raise ValueError("Unknown head type: {}".format(self._type))

        if isinstance(self._head, dict):
            w_cat, b_cat, splits = self._fused
            y = pallas_linear(obs, w_cat, b_cat)
            out = {}
            off = 0
            for k, d in splits:
                out[k] = y[:, off:off + d]
                off += d
            return out
        w, b = self._head
        return pallas_linear(obs, w, b)


# --------------------------------- main --------------------------------------
if __name__ == "__main__":
    key = jax.random.PRNGKey(0)
    k_obs, k_disc, k_gauss, k_scal, k_big, k_wide = jax.random.split(key, 6)

    batch, in_dim, out_dim = 8, 32, 16
    obs = jax.random.normal(k_obs, (batch, in_dim), jnp.float32)

    # discrete / continuous head: single linear -> [batch, out_dim]
    disc_head = HeadBuilder(OutputSpec(dim=[out_dim], type_="discrete"), k_disc)
    y_disc = disc_head(obs)
    jax.block_until_ready(y_disc)
    assert y_disc.shape == (batch, out_dim)
    w, b = disc_head._head
    assert jnp.allclose(y_disc, obs @ w + b, atol=1e-5, rtol=1e-5)

    # gaussian head (mean/std fused in one pallas_call) -> dict of [B, out_dim]
    gauss_head = HeadBuilder(OutputSpec(dim=[out_dim], type_="gaussian"), k_gauss)
    y_gauss = gauss_head(obs)
    jax.block_until_ready(y_gauss["mean"])
    jax.block_until_ready(y_gauss["std"])
    assert set(y_gauss.keys()) == {"mean", "std"}
    assert y_gauss["mean"].shape == (batch, out_dim)
    assert y_gauss["std"].shape == (batch, out_dim)
    wm, bm = gauss_head._head["mean"]
    ws, bs = gauss_head._head["std"]
    assert jnp.allclose(y_gauss["mean"], obs @ wm + bm, atol=1e-5, rtol=1e-5)
    assert jnp.allclose(y_gauss["std"], obs @ ws + bs, atol=1e-5, rtol=1e-5)

    # scalar head: linear to 1 output -> [batch, 1]
    scal_head = HeadBuilder(OutputSpec(dim=[out_dim], type_="scalar"), k_scal)
    y_scal = scal_head(obs)
    jax.block_until_ready(y_scal)
    assert y_scal.shape == (batch, 1)
    w1, b1 = scal_head._head
    assert jnp.allclose(y_scal, obs @ w1 + b1, atol=1e-5, rtol=1e-5)

    # Ragged batch path (no wrapper pad): batch neither tile- nor sublane-aligned,
    # >=2 batch grid steps exercised.
    big_batch = 523
    obs_big = jax.random.normal(k_big, (big_batch, in_dim), jnp.float32)
    y_big = pallas_linear(obs_big, w, b)
    jax.block_until_ready(y_big)
    assert y_big.shape == (big_batch, out_dim)
    assert jnp.allclose(y_big, obs_big @ w + b, atol=1e-5, rtol=1e-5)

    # OUT (N) tiled path: force a small N tile so grid_n > 1 with a ragged
    # padded last column block (OUT=300 -> OUT_P=384, TILE_N=256).
    wide_out = 300
    kw, kb = jax.random.split(k_wide)
    w_wide = jax.random.normal(kw, (in_dim, wide_out), jnp.float32) * 0.1
    b_wide = jax.random.normal(kb, (1, wide_out), jnp.float32) * 0.1
    y_wide = pallas_linear(obs, w_wide, b_wide, max_out_tile=256)
    jax.block_until_ready(y_wide)
    assert y_wide.shape == (batch, wide_out)
    assert jnp.allclose(y_wide, obs @ w_wide + b_wide, atol=1e-5, rtol=1e-5)

    # Tiny batch (< sublane, not a multiple of 8): block equals full batch dim.
    obs_small = obs[:3]
    y_small = pallas_linear(obs_small, w, b)
    jax.block_until_ready(y_small)
    assert jnp.allclose(y_small, obs_small @ w + b, atol=1e-5, rtol=1e-5)

    print("KERNEL_OK")
</pallas_src>

<mosaic_0001>
module attributes {stable_mosaic.version = 11 : i64} {
  func.func @_linear_kernel(%arg0: i32, %arg1: i32, %arg2: memref<8x32xf32, #tpu.memory_space<vmem>>, %arg3: memref<32x128xf32, #tpu.memory_space<vmem>>, %arg4: memref<1x128xf32, #tpu.memory_space<vmem>>, %arg5: memref<8x128xf32, #tpu.memory_space<vmem>>) attributes {dimension_semantics = [#tpu.dimension_semantics<parallel>, #tpu.dimension_semantics<parallel>], iteration_bounds = array<i64: 1, 1>, scalar_prefetch = 0 : i64, scratch_operands = 0 : i64, tpu.core_type = #tpu.core_type<tc>, window_params = [{transform_indices = @transform_0, window_bounds = array<i64: 8, 32>}, {transform_indices = @transform_1, window_bounds = array<i64: 32, 128>}, {transform_indices = @transform_2, window_bounds = array<i64: 1, 128>}, {transform_indices = @transform_3, window_bounds = array<i64: 8, 128>}]} {
    %c0 = arith.constant 0 : index
    %c0_0 = arith.constant 0 : index
    %0 = vector.load %arg2[%c0, %c0_0] : memref<8x32xf32, #tpu.memory_space<vmem>>, vector<8x32xf32>
    %c0_1 = arith.constant 0 : index
    %c0_2 = arith.constant 0 : index
    %1 = vector.load %arg3[%c0_1, %c0_2] : memref<32x128xf32, #tpu.memory_space<vmem>>, vector<32x128xf32>
    %cst = arith.constant dense<0.000000e+00> : vector<8x128xf32>
    %2 = tpu.matmul %0, %1, %cst {dimension_numbers = #tpu.dot_dimension_numbers<[1], [0], [0], [1], [0, 0, 1, 1], [], []>} : vector<8x32xf32>, vector<32x128xf32>, vector<8x128xf32> -> vector<8x128xf32>
    %c0_3 = arith.constant 0 : index
    %c0_4 = arith.constant 0 : index
    %3 = vector.load %arg4[%c0_3, %c0_4] : memref<1x128xf32, #tpu.memory_space<vmem>>, vector<1x128xf32>
    %4 = vector.broadcast %3 : vector<1x128xf32> to vector<8x128xf32>
    %5 = arith.addf %2, %4 : vector<8x128xf32>
    %c0_5 = arith.constant 0 : index
    %c0_6 = arith.constant 0 : index
    %6 = vector.load %arg5[%c0_5, %c0_6] : memref<8x128xf32, #tpu.memory_space<vmem>>, vector<8x128xf32>
    tpu.vector_store %arg5[%c0_5, %c0_6], %5 {strides = array<i32>} : memref<8x128xf32, #tpu.memory_space<vmem>>, vector<8x128xf32>,
    return
  }
  func.func @transform_0(%arg0: i32, %arg1: i32) -> (i32, i32) {
    %c0_i32 = arith.constant 0 : i32
    %c0_i32_0 = arith.constant 0 : i32
    return %arg0, %c0_i32 : i32, i32
  }
  func.func @transform_1(%arg0: i32, %arg1: i32) -> (i32, i32) {
    %c0_i32 = arith.constant 0 : i32
    %c0_i32_0 = arith.constant 0 : i32
    return %c0_i32, %arg1 : i32, i32
  }
  func.func @transform_2(%arg0: i32, %arg1: i32) -> (i32, i32) {
    %c0_i32 = arith.constant 0 : i32
    %c0_i32_0 = arith.constant 0 : i32
    return %c0_i32, %arg1 : i32, i32
  }
  func.func @transform_3(%arg0: i32, %arg1: i32) -> (i32, i32) {
    %c0_i32 = arith.constant 0 : i32
    return %arg0, %arg1 : i32, i32
  }
}

</mosaic_0001>

<bundles_post_ra>
// kernel: tpu_custom_call.1
= control target key start
LH: loop header
LB: loop body
LE: loop exit
PB: predicated region body
PF: predicated region fallthrough
CT: control target
= control target key end

     0   :  { %8 = vsyncpa [#allocation3], 0  ;;  %s322_s0 = inlined_call_operand.hbm [shape: f32[8,32], index: 0, kind: input, shape index: {}]   ;;  %s323_s1 = inlined_call_operand.hbm [shape: f32[32,128], index: 1, kind: input, shape index: {}]   ;;  %s324_s2 = inlined_call_operand.vmem [shape: f32[1,128], index: 2, kind: input, shape index: {}]   ;;  %s325_s3 = inlined_call_operand.hbm [shape: f32[8,128], index: 3, kind: output, shape index: {}]  }
   0x1   :  { %9 = vsyncpa [#allocation6], 0 }
   0x2   :  { %10 = vsyncpa [#allocation4], 0  ;;  %s248_s12 = smov [#allocation2]   ;;  %s249_s14 = smov [#allocation5]  }
   0x3   :  { %s17_s13 = sshll.u32 %s248_s12, 4  ;;  %s26_s15 = sshll.u32 %s249_s14, 4  ;;  %s18_s13 = int_to_ptr.vmem [resolvable:$true] %s17_s13  ;;  %s276_s15 = int_to_ptr.vmem [resolvable:$true] %s26_s15 }
   0x4   :  { %s176_s18 = scalar_lea.hbm %s322_s0, 128 }
   0x5   :  { %p177_p0 = scmp.ne.s32.totalorder %s322_s0, %s176_s18  ;;  %p180_p1 = scmp.lt.u32.totalorder %s176_s18, %s322_s0 }
   0x7   :  { %p182_p2 = pnand %p180_p1, %p177_p0 }
   0x9   :  { %185 = shalt.err (!%p182_p2)
}
   0xa   :  { %s186_s23 = scalar_lea.vmem %s18_s13, 128  ;;  %p191_p4 = scmp.lt.s32.totalorder %s18_s13, %s18_s13 }
   0xb   :  { %p187_p3 = scmp.ne.s32.totalorder %s18_s13, %s186_s23  ;;  %p192_p5 = scmp.lt.s32.totalorder %s186_s23, %s186_s23 }
   0xd   :  { %p193_p6 = por %p192_p5, %p191_p4 }
   0xf   :  { %p194_p7 = pnand %p193_p6, %p187_p3 }
  0x11   :  { %197 = shalt.err (!%p194_p7)
}
  0x12   :  { %20 = dma.hbm_to_vmem [thread:$0]  %s322_s0, 128, %s18_s13, [#allocation3]  }
  0x13   :  { %s198_s28 = scalar_lea.hbm %s323_s1, 512 }
  0x14   :  { %p199_p8 = scmp.ne.s32.totalorder %s323_s1, %s198_s28  ;;  %p202_p9 = scmp.lt.u32.totalorder %s198_s28, %s323_s1 }
  0x16   :  { %p204_p10 = pnand %p202_p9, %p199_p8 }
  0x18   :  { %207 = shalt.err (!%p204_p10)
}
  0x19   :  { %s208_s6 = scalar_lea.vmem %s276_s15, 512  ;;  %p213_p12 = scmp.lt.s32.totalorder %s276_s15, %s276_s15 }
  0x1a   :  { %p209_p11 = scmp.ne.s32.totalorder %s276_s15, %s208_s6  ;;  %p214_p13 = scmp.lt.s32.totalorder %s208_s6, %s208_s6 }
  0x1c   :  { %p215_p0 = por %p214_p13, %p213_p12 }
  0x1e   :  { %p216_p1 = pnand %p215_p0, %p209_p11 }
  0x20   :  { %219 = shalt.err (!%p216_p1)
}
  0x21   :  { %s250_s0 = smov 128   ;;  %s251_s7 = smov 8  }
  0x22   :  { %32 = dma.hbm_to_vmem [thread:$0]  %s323_s1, 512, %s276_s15, [#allocation6], %s250_s0, %s250_s0, %s251_s7  }
  0x23   :  { %242 = dma.done.wait [#allocation3], 128  }
  0x24   :  { %243 = vsyncadd [#allocation3], 4294967168 }
  0x25   :  { %244 = dma.done.wait [#allocation6], 512  }
  0x26   :  { %245 = vsyncadd [#allocation6], 4294966784  ;;  %v252_v0 = vmov 0.0|0.0   ;;  %vm253_vm0 = vmmov 0   ;;  %v254_v1 = vmov 0.0   ;;  %v42_v2 = vld [vmem:[#allocation5] sm:$0xff] }
  0x27   :  { %162 = vmatprep.subr.bf16.mxu0 %v252_v0  ;;  %159 = vmatprep.mubr.msk.f32.mxu0 %vm253_vm0, %v254_v1  ;;  %v43_v3 = vld [vmem:[#allocation5 + $0x8] sm:$0xff]  ;;  %v44_v4 = vld [vmem:[#allocation5 + $0x10] sm:$0xff]  ;;  %v45_v6 = vld [vmem:[#allocation5 + $0x18] sm:$0xff]  ;;  %vm53_vm1 = vcmask 261120   ;;  %s255_s11 = smov [#allocation7]  }
  0x28   :  { %v163_v5 = vpack.c.bf16 %v43_v3, %v42_v2  ;;  %v166_v7 = vpack.c.bf16 %v45_v6, %v44_v4  ;;  %v41_v8 = vld [vmem:[#allocation2] sm:$0xff]  ;;  %s134_s12 = sshll.u32 %s255_s11, 4  ;;  %s135_s12 = int_to_ptr.vmem [resolvable:$true] %s134_s12 }
  0x29   :  { %v144_v9 = vld [vmem:[%s324_s2] ss:$0 sm:$0xff]  ;;  %s220_s13 = scalar_lea.vmem %s135_s12, 128  ;;  %p225_p3 = scmp.lt.s32.totalorder %s135_s12, %s135_s12 }
  0x2a   :  { %164 = vmatpush3.bf16.msra.mxu0 %v163_v5  ;;  %p221_p2 = scmp.ne.s32.totalorder %s135_s12, %s220_s13  ;;  %p226_p4 = scmp.lt.s32.totalorder %s220_s13, %s220_s13 }
  0x2b   :  { %165 = vmatprep.subr.bf16.mxu0 %v252_v0 }
  0x2c   :  { %p227_p5 = por %p226_p4, %p225_p3 }
  0x2e   :  { %167 = vmatpush3.bf16.msra.mxu0 %v166_v7  ;;  %p228_p6 = pnand %p227_p5, %p221_p2 }
  0x31   :  { %160 = vmatmul.mubr.msk.f32.vlgmr.msra.gmra.mrb[0].mxu0 %vm53_vm1, %v41_v8 }
 0x104   :  { %v123_v10 = vpop.f32.mrb[0].mxu0 }
 0x105   :  { %v124_v11 = vadd.f32 %v144_v9, %v123_v10  ;;  %v161_v12 = vpop.f32.mrb[1].mxu0 }
 0x107   :  { %127 = vst [vmem:[#allocation7] sm:$0xff] %v124_v11 }
 0x108   :  { %231 = shalt.err (!%p228_p6)
}
 0x109   :  { %s232_s16 = scalar_lea.hbm %s325_s3, 128 }
 0x10a   :  { %p233_p7 = scmp.ne.s32.totalorder %s325_s3, %s232_s16  ;;  %p236_p8 = scmp.lt.u32.totalorder %s232_s16, %s325_s3 }
 0x10c   :  { %p238_p9 = pnand %p236_p8, %p233_p7 }
 0x10e   :  { %241 = shalt.err (!%p238_p9)
}
 0x10f   :  { %137 = dma.vmem_to_hbm [thread:$0]  %s135_s12, 128, %s325_s3, [#allocation4]  }
 0x110   :  { %246 = dma.done.wait [#allocation4], 128  }
 0x111   :  { %247 = vsyncadd [#allocation4], 4294967168 }
 0x112   :  { %141 = vsyncpa [#allocation3], 1 }
 0x113   :  { %142 = vsyncpa [#allocation6], 1 }
 0x114   :  { %143 = vsyncpa [#allocation4], 1 }

</bundles_post_ra>
